<compile_context>
chip_gen: v7x
topology: tpu7x:2x2x1
jax: 0.10.0
libtpu: 0.0.40
codegen_flags: <defaults>
</compile_context>

<pallas_src>
import functools

import jax
import jax.numpy as jnp
from jax.experimental import pallas as pl
from jax.experimental.pallas import tpu as pltpu

IN_FEATURES = 1 * 28 * 28   # 784
HID = 28                    # real hidden width (PyTorch fc1 out_features)
OUT = 10                    # real number of classes
HID_PAD = 128               # MXU / lane friendly hidden width
OUT_PAD = 128               # lane-dense output width
NEG_BIG = -1.0e30           # "minus infinity" for padded logit columns


def _round_up(x, m):
    return ((x + m - 1) // m) * m


def _mnist_kernel(x_ref, w1_ref, b1_ref, w2_ref, b2_ref, o_ref):
    # x_ref:  [TB, 784] bf16    w1_ref: [784, 128] bf16   b1_ref: [1, 128] f32
    # w2_ref: [128, 128] bf16   b2_ref: [1, 128] f32      o_ref:  [TB, 128] f32
    x = x_ref[...]

    # fc1 + relu. bf16 MXU inputs, f32 accumulation. Padded hidden columns have
    # zero weights/bias -> relu(0) = 0, so they contribute nothing downstream.
    h = jnp.dot(x, w1_ref[...], preferred_element_type=jnp.float32) + b1_ref[...]
    h = jnp.maximum(h, 0.0)

    # fc2. Padded output columns get bias -1e30 -> exp() == 0 below. Only the
    # dot operands are bf16; the add stays in f32.
    logits = (
        jnp.dot(h.astype(jnp.bfloat16), w2_ref[...],
                preferred_element_type=jnp.float32)
        + b2_ref[...]
    )

    # Numerically stable log_softmax over the (padded) last dim, all f32;
    # padded columns do not affect the max or the sum.
    m = jnp.max(logits, axis=-1, keepdims=True)
    shifted = logits - m
    lse = jnp.log(jnp.sum(jnp.exp(shifted), axis=-1, keepdims=True))
    o_ref[...] = (shifted - lse).astype(o_ref.dtype)


def prepare_params(w1, b1, w2, b2):
    """One-time padding/cast of parameters to kernel-friendly layout.

    w1: [784, 28], b1: [1, 28], w2: [28, 10], b2: [1, 10]
    (weights stored transposed vs. PyTorch so the kernel computes x @ W + b).
    Returns (w1p, b1p, w2p, b2p): bf16 weights, f32 biases, padded to 128 lanes.
    """
    w1p = (jnp.zeros((IN_FEATURES, HID_PAD), jnp.float32)
           .at[:, :HID].set(w1).astype(jnp.bfloat16))
    b1p = jnp.zeros((1, HID_PAD), jnp.float32).at[:, :HID].set(b1)
    w2p = (jnp.zeros((HID_PAD, OUT_PAD), jnp.float32)
           .at[:HID, :OUT].set(w2).astype(jnp.bfloat16))
    b2p = jnp.full((1, OUT_PAD), NEG_BIG, jnp.float32).at[:, :OUT].set(b2)
    return w1p, b1p, w2p, b2p


def mnist_forward(x_nchw, params, *, tb=2048):
    """x_nchw: [B, 1, 28, 28] -> log-probs [B, 10] (float32).

    `params` is the tuple returned by prepare_params() (padded once, reused).
    """
    w1p, b1p, w2p, b2p = params
    B = x_nchw.shape[0]
    # Cast to bf16 here: under jit this fuses with the reshape/pad, and it
    # halves the dominant HBM traffic (the 784-wide activation stream).
    x2d = x_nchw.reshape(B, IN_FEATURES).astype(jnp.bfloat16)

    # Batch tile selection. Cap at tb (=2048 default: safe on v7x's smaller
    # VMEM), and make sure mid-size batches produce >=2 grid steps so the
    # "parallel" axis can be sharded across v7x's two TensorCores.
    if B > tb:
        tb_eff = tb
        padded_b = _round_up(B, tb_eff)
    elif B >= 16:
        tb_eff = _round_up(pl.cdiv(B, 2), 8)
        padded_b = 2 * tb_eff
    else:
        tb_eff = max(8, _round_up(B, 8))
        padded_b = tb_eff

    if padded_b != B:
        # Zero-padded rows produce valid (ignored) log-probs; sliced off below.
        x2d = jnp.pad(x2d, ((0, padded_b - B), (0, 0)))

    num_tiles = padded_b // tb_eff

    out = pl.pallas_call(
        _mnist_kernel,
        out_shape=jax.ShapeDtypeStruct((padded_b, OUT_PAD), jnp.float32),
        grid=(num_tiles,),
        in_specs=[
            # x tiles stream over the batch axis (default double-buffering;
            # overlap comes from the larger tile, not deeper buffering).
            pl.BlockSpec((tb_eff, IN_FEATURES), lambda i: (i, 0)),
            # Weights/biases: same block every step -> stay resident in VMEM.
            pl.BlockSpec((IN_FEATURES, HID_PAD), lambda i: (0, 0)),
            pl.BlockSpec((1, HID_PAD), lambda i: (0, 0)),
            pl.BlockSpec((HID_PAD, OUT_PAD), lambda i: (0, 0)),
            pl.BlockSpec((1, OUT_PAD), lambda i: (0, 0)),
        ],
        out_specs=pl.BlockSpec((tb_eff, OUT_PAD), lambda i: (i, 0)),
        compiler_params=pltpu.CompilerParams(
            # Independent batch tiles -> megacore sharding on v7x.
            dimension_semantics=("parallel",),
        ),
    )(x2d, w1p, b1p, w2p, b2p)

    # Drop batch padding and the padded logit columns. Under jit this slice
    # fuses into the consumer; callers that keep consuming the padded [_,128]
    # block directly must mask columns 10:128 (they hold ~-1e30 logits).
    return out[:B, :OUT]


def init_params(key):
    """Deterministic init mimicking nn.Linear default (uniform +/- 1/sqrt(fan_in))."""
    k1, k2, k3, k4 = jax.random.split(key, 4)
    bound1 = 1.0 / jnp.sqrt(float(IN_FEATURES))
    bound2 = 1.0 / jnp.sqrt(float(HID))
    # Stored transposed relative to PyTorch so the kernel does x @ W.
    w1 = jax.random.uniform(k1, (IN_FEATURES, HID), jnp.float32, -bound1, bound1)
    b1 = jax.random.uniform(k2, (1, HID), jnp.float32, -bound1, bound1)
    w2 = jax.random.uniform(k3, (HID, OUT), jnp.float32, -bound2, bound2)
    b2 = jax.random.uniform(k4, (1, OUT), jnp.float32, -bound2, bound2)
    return w1, b1, w2, b2


def _reference(x_nchw, w1, b1, w2, b2):
    x2d = x_nchw.reshape(x_nchw.shape[0], IN_FEATURES).astype(jnp.float32)
    h = jnp.maximum(x2d @ w1 + b1, 0.0)
    logits = h @ w2 + b2
    return jax.nn.log_softmax(logits, axis=-1)


if __name__ == "__main__":
    key = jax.random.PRNGKey(0)
    kx, kp, kx2 = jax.random.split(key, 3)
    w1, b1, w2, b2 = init_params(kp)
    params = prepare_params(w1, b1, w2, b2)   # padded once, reused per call

    fwd = jax.jit(functools.partial(mnist_forward, params=params))

    # Small shape matching the PyTorch forward: [batch, 1, 28, 28].
    x_small = jax.random.normal(kx, (2, 1, 28, 28), dtype=jnp.float32)
    out_small = jax.block_until_ready(fwd(x_small))
    ref_small = _reference(x_small, w1, b1, w2, b2)
    assert out_small.shape == (2, OUT)
    # bf16 matmul inputs -> loosened tolerance vs. the f32 reference.
    assert jnp.allclose(out_small, ref_small, atol=5e-2, rtol=5e-2)
    assert jnp.array_equal(jnp.argmax(out_small, -1), jnp.argmax(ref_small, -1))

    # Also exercise the multi-tile + ragged-batch path (B=600 -> 2 tiles of 304).
    x_big = jax.random.normal(kx2, (600, 1, 28, 28), dtype=jnp.float32)
    out_big = jax.block_until_ready(fwd(x_big))
    ref_big = _reference(x_big, w1, b1, w2, b2)
    assert out_big.shape == (600, OUT)
    assert jnp.allclose(out_big, ref_big, atol=5e-2, rtol=5e-2)
    assert jnp.mean(
        (jnp.argmax(out_big, -1) == jnp.argmax(ref_big, -1)).astype(jnp.float32)
    ) > 0.99

    print("KERNEL_OK")
</pallas_src>

<mosaic_0001>
module attributes {stable_mosaic.version = 11 : i64} {
  func.func @_mnist_kernel(%arg0: i32, %arg1: memref<8x784xbf16, #tpu.memory_space<vmem>>, %arg2: memref<784x128xbf16, #tpu.memory_space<vmem>>, %arg3: memref<1x128xf32, #tpu.memory_space<vmem>>, %arg4: memref<128x128xbf16, #tpu.memory_space<vmem>>, %arg5: memref<1x128xf32, #tpu.memory_space<vmem>>, %arg6: memref<8x128xf32, #tpu.memory_space<vmem>>) attributes {dimension_semantics = [#tpu.dimension_semantics<parallel>], iteration_bounds = array<i64: 1>, scalar_prefetch = 0 : i64, scratch_operands = 0 : i64, tpu.core_type = #tpu.core_type<tc>, window_params = [{transform_indices = @transform_0, window_bounds = array<i64: 8, 784>}, {pipeline_mode = #tpu.pipeline_mode<synchronous>, transform_indices = @transform_1, window_bounds = array<i64: 784, 128>}, {pipeline_mode = #tpu.pipeline_mode<synchronous>, transform_indices = @transform_2, window_bounds = array<i64: 1, 128>}, {pipeline_mode = #tpu.pipeline_mode<synchronous>, transform_indices = @transform_3, window_bounds = array<i64: 128, 128>}, {pipeline_mode = #tpu.pipeline_mode<synchronous>, transform_indices = @transform_4, window_bounds = array<i64: 1, 128>}, {transform_indices = @transform_5, window_bounds = array<i64: 8, 128>}]} {
    %c0 = arith.constant 0 : index
    %c0_0 = arith.constant 0 : index
    %0 = vector.load %arg1[%c0, %c0_0] : memref<8x784xbf16, #tpu.memory_space<vmem>>, vector<8x784xbf16>
    %c0_1 = arith.constant 0 : index
    %c0_2 = arith.constant 0 : index
    %1 = vector.load %arg2[%c0_1, %c0_2] : memref<784x128xbf16, #tpu.memory_space<vmem>>, vector<784x128xbf16>
    %cst = arith.constant dense<0.000000e+00> : vector<8x128xf32>
    %2 = tpu.matmul %0, %1, %cst {dimension_numbers = #tpu.dot_dimension_numbers<[1], [0], [0], [1], [0, 0, 1, 1], [], []>} : vector<8x784xbf16>, vector<784x128xbf16>, vector<8x128xf32> -> vector<8x128xf32>
    %c0_3 = arith.constant 0 : index
    %c0_4 = arith.constant 0 : index
    %3 = vector.load %arg3[%c0_3, %c0_4] : memref<1x128xf32, #tpu.memory_space<vmem>>, vector<1x128xf32>
    %4 = vector.broadcast %3 : vector<1x128xf32> to vector<8x128xf32>
    %5 = arith.addf %2, %4 : vector<8x128xf32>
    %cst_5 = arith.constant 0.000000e+00 : f32
    %6 = vector.broadcast %cst_5 : f32 to vector<8x128xf32>
    %7 = arith.maximumf %5, %6 : vector<8x128xf32>
    %8 = arith.truncf %7 : vector<8x128xf32> to vector<8x128xbf16>
    %c0_6 = arith.constant 0 : index
    %c0_7 = arith.constant 0 : index
    %9 = vector.load %arg4[%c0_6, %c0_7] : memref<128x128xbf16, #tpu.memory_space<vmem>>, vector<128x128xbf16>
    %cst_8 = arith.constant dense<0.000000e+00> : vector<8x128xf32>
    %10 = tpu.matmul %8, %9, %cst_8 {dimension_numbers = #tpu.dot_dimension_numbers<[1], [0], [0], [1], [0, 0, 1, 1], [], []>} : vector<8x128xbf16>, vector<128x128xbf16>, vector<8x128xf32> -> vector<8x128xf32>
    %c0_9 = arith.constant 0 : index
    %c0_10 = arith.constant 0 : index
    %11 = vector.load %arg5[%c0_9, %c0_10] : memref<1x128xf32, #tpu.memory_space<vmem>>, vector<1x128xf32>
    %12 = vector.broadcast %11 : vector<1x128xf32> to vector<8x128xf32>
    %13 = arith.addf %10, %12 : vector<8x128xf32>
    %cst_11 = arith.constant dense<0xFF800000> : vector<8xf32>
    %14 = vector.multi_reduction <maximumf>, %13, %cst_11 [1] : vector<8x128xf32> to vector<8xf32>
    %15 = vector.shape_cast %14 : vector<8xf32> to vector<8x1xf32>
    %16 = vector.broadcast %15 : vector<8x1xf32> to vector<8x128xf32>
    %17 = arith.subf %13, %16 : vector<8x128xf32>
    %18 = math.exp %17 : vector<8x128xf32>
    %cst_12 = arith.constant dense<0.000000e+00> : vector<8xf32>
    %19 = vector.multi_reduction <add>, %18, %cst_12 [1] : vector<8x128xf32> to vector<8xf32>
    %20 = vector.shape_cast %19 : vector<8xf32> to vector<8x1xf32>
    %21 = math.log %20 : vector<8x1xf32>
    %22 = vector.broadcast %21 : vector<8x1xf32> to vector<8x128xf32>
    %23 = arith.subf %17, %22 : vector<8x128xf32>
    %c0_13 = arith.constant 0 : index
    %c0_14 = arith.constant 0 : index
    %24 = vector.load %arg6[%c0_13, %c0_14] : memref<8x128xf32, #tpu.memory_space<vmem>>, vector<8x128xf32>
    tpu.vector_store %arg6[%c0_13, %c0_14], %23 {strides = array<i32>} : memref<8x128xf32, #tpu.memory_space<vmem>>, vector<8x128xf32>,
    return
  }
  func.func @transform_0(%arg0: i32) -> (i32, i32) {
    %c0_i32 = arith.constant 0 : i32
    %c0_i32_0 = arith.constant 0 : i32
    return %arg0, %c0_i32 : i32, i32
  }
  func.func @transform_1(%arg0: i32) -> (i32, i32) {
    %c0_i32 = arith.constant 0 : i32
    %c0_i32_0 = arith.constant 0 : i32
    %c0_i32_1 = arith.constant 0 : i32
    return %c0_i32, %c0_i32_0 : i32, i32
  }
  func.func @transform_2(%arg0: i32) -> (i32, i32) {
    %c0_i32 = arith.constant 0 : i32
    %c0_i32_0 = arith.constant 0 : i32
    %c0_i32_1 = arith.constant 0 : i32
    return %c0_i32, %c0_i32_0 : i32, i32
  }
  func.func @transform_3(%arg0: i32) -> (i32, i32) {
    %c0_i32 = arith.constant 0 : i32
    %c0_i32_0 = arith.constant 0 : i32
    %c0_i32_1 = arith.constant 0 : i32
    return %c0_i32, %c0_i32_0 : i32, i32
  }
  func.func @transform_4(%arg0: i32) -> (i32, i32) {
    %c0_i32 = arith.constant 0 : i32
    %c0_i32_0 = arith.constant 0 : i32
    %c0_i32_1 = arith.constant 0 : i32
    return %c0_i32, %c0_i32_0 : i32, i32
  }
  func.func @transform_5(%arg0: i32) -> (i32, i32) {
    %c0_i32 = arith.constant 0 : i32
    %c0_i32_0 = arith.constant 0 : i32
    return %arg0, %c0_i32 : i32, i32
  }
}

</mosaic_0001>

<bundles_post_ra>
// kernel: mnist_forward.1
= control target key start
LH: loop header
LB: loop body
LE: loop exit
PB: predicated region body
PF: predicated region fallthrough
CT: control target
= control target key end

     0   :  { %10 = vsyncpa [#allocation3], 0  ;;  %s1022_s18 = smov [#allocation2]   ;;  %s1116_s0 = inlined_call_operand.vmem [shape: bf16[8,784], index: 0, kind: input, shape index: {}]   ;;  %s1117_s1 = inlined_call_operand.hbm [shape: bf16[784,128], index: 1, kind: input, shape index: {}]   ;;  %s1118_s2 = inlined_call_operand.vmem [shape: f32[1,128], index: 2, kind: input, shape index: {}]   ;;  %s1119_s3 = inlined_call_operand.vmem [shape: bf16[128,128], index: 3, kind: input, shape index: {}]   ;;  %s1120_s4 = inlined_call_operand.vmem [shape: f32[1,128], index: 4, kind: input, shape index: {}]   ;;  %s1121_s5 = inlined_call_operand.vmem [shape: f32[8,128], index: 5, kind: output, shape index: {}]  }
   0x1   :  { %s18_s19 = sshll.u32 %s1022_s18, 4  ;;  %s998_s22 = scalar_lea.hbm %s1117_s1, 6272  ;;  %s19_s19 = int_to_ptr.vmem [resolvable:$true] %s18_s19 }
   0x2   :  { %p999_p0 = scmp.ne.s32.totalorder %s1117_s1, %s998_s22  ;;  %p1002_p1 = scmp.lt.u32.totalorder %s998_s22, %s1117_s1 }
   0x4   :  { %p1004_p2 = pnand %p1002_p1, %p999_p0 }
   0x6   :  { %1007 = shalt.err (!%p1004_p2)
}
   0x7   :  { %s1008_s27 = scalar_lea.vmem %s19_s19, 6272  ;;  %p1013_p4 = scmp.lt.s32.totalorder %s19_s19, %s19_s19 }
   0x8   :  { %p1009_p3 = scmp.ne.s32.totalorder %s19_s19, %s1008_s27  ;;  %p1014_p5 = scmp.lt.s32.totalorder %s1008_s27, %s1008_s27 }
   0xa   :  { %p1015_p6 = por %p1014_p5, %p1013_p4 }
   0xc   :  { %p1016_p7 = pnand %p1015_p6, %p1009_p3 }
   0xe   :  { %1019 = shalt.err (!%p1016_p7)
}
   0xf   :  { %s1023_s28 = smov 64   ;;  %s1024_s29 = smov 4  }
  0x10   :  { %24 = dma.hbm_to_vmem [thread:$0]  %s1117_s1, 6272, %s19_s19, [#allocation3], %s1023_s28, %s1023_s28, %s1024_s29  }
  0x11   :  { %1020 = dma.done.wait [#allocation3], 6272  }
  0x12   :  { %1021 = vsyncadd [#allocation3], 4294961024  ;;  %v930_v0 = vld [vmem:[#allocation2 + $0x40] sm:$0xff]   ;;  %v934_v4 = vld [vmem:[#allocation2 + $0x48] sm:$0xff]   ;;  %v1025_v43 = vmov 0.0   ;;  %vm1026_vm0 = vmmov 0  }
  0x13   :  { %v931_v1 = vld [vmem:[#allocation2] sm:$0xff]   ;;  %822 = vmatprep.subr.bf16.mxu0 %v930_v0  ;;  %v935_v5 = vld [vmem:[#allocation2 + $0x8] sm:$0xff]   ;;  %v938_v8 = vld [vmem:[#allocation2 + $0x50] sm:$0xff]   ;;  %vm462_vm1 = vcmask 130048  }
  0x14   :  { %v932_v2 = vld [vmem:[#allocation2 + $0xc0] sm:$0xff]   ;;  %823 = vmatpush3.bf16.msra.mxu0 %v931_v1  ;;  %v936_v6 = vld [vmem:[#allocation2 + $0xc8] sm:$0xff]   ;;  %v939_v9 = vld [vmem:[#allocation2 + $0x10] sm:$0xff]  }
  0x15   :  { %v933_v3 = vld [vmem:[#allocation2 + $0x80] sm:$0xff]   ;;  %844 = vmatprep.subr.bf16.mxu1 %v932_v2  ;;  %824 = vmatprep.subr.bf16.mxu0 %v934_v4  ;;  %v937_v7 = vld [vmem:[#allocation2 + $0x88] sm:$0xff]   ;;  %v940_v10 = vld [vmem:[#allocation2 + $0xd0] sm:$0xff]  }
  0x16   :  { %845 = vmatpush3.bf16.msra.mxu1 %v933_v3  ;;  %v941_v11 = vld [vmem:[#allocation2 + $0x90] sm:$0xff]   ;;  %v942_v12 = vld [vmem:[#allocation2 + $0x58] sm:$0xff]   ;;  %v946_v16 = vld [vmem:[#allocation2 + $0x60] sm:$0xff]  }
  0x17   :  { %846 = vmatprep.subr.bf16.mxu1 %v936_v6  ;;  %v943_v13 = vld [vmem:[#allocation2 + $0x18] sm:$0xff]   ;;  %v947_v17 = vld [vmem:[#allocation2 + $0x20] sm:$0xff]   ;;  %v950_v20 = vld [vmem:[#allocation2 + $0x68] sm:$0xff]  }
  0x18   :  { %825 = vmatpush3.bf16.msra.mxu0 %v935_v5  ;;  %v944_v14 = vld [vmem:[#allocation2 + $0xd8] sm:$0xff]   ;;  %v948_v18 = vld [vmem:[#allocation2 + $0xe0] sm:$0xff]   ;;  %v951_v21 = vld [vmem:[#allocation2 + $0x28] sm:$0xff]  }
  0x19   :  { %826 = vmatprep.subr.bf16.mxu0 %v938_v8  ;;  %v945_v15 = vld [vmem:[#allocation2 + $0x98] sm:$0xff]   ;;  %v949_v19 = vld [vmem:[#allocation2 + $0xa0] sm:$0xff]   ;;  %v952_v22 = vld [vmem:[#allocation2 + $0xe8] sm:$0xff]  }
  0x1a   :  { %847 = vmatpush3.bf16.msra.mxu1 %v937_v7  ;;  %v953_v23 = vld [vmem:[#allocation2 + $0xa8] sm:$0xff]   ;;  %v954_v24 = vld [vmem:[#allocation2 + $0x70] sm:$0xff]   ;;  %v958_v28 = vld [vmem:[#allocation2 + $0x78] sm:$0xff]  }
  0x1b   :  { %848 = vmatprep.subr.bf16.mxu1 %v940_v10  ;;  %v955_v25 = vld [vmem:[#allocation2 + $0x30] sm:$0xff]   ;;  %v959_v29 = vld [vmem:[#allocation2 + $0x38] sm:$0xff]   ;;  %v35_v31 = vld [vmem:[%s1116_s0] sm:$0xff] }
  0x1c   :  { %827 = vmatpush3.bf16.msra.mxu0 %v939_v9  ;;  %v956_v26 = vld [vmem:[#allocation2 + $0xf0] sm:$0xff]   ;;  %v960_v30 = vld [vmem:[#allocation2 + $0xf8] sm:$0xff]   ;;  %v756_v32 = vcombine.low %v35_v31, %v35_v31  ;;  %v757_v33 = vcombine.high %v35_v31, %v35_v31  ;;  %v964_v35 = vld [vmem:[#allocation2 + $0x140] sm:$0xff]  }
  0x1d   :  { %828 = vmatprep.subr.bf16.mxu0 %v942_v12  ;;  %v957_v27 = vld [vmem:[#allocation2 + $0xb0] sm:$0xff]   ;;  %v963_v34 = vld [vmem:[#allocation2 + $0xb8] sm:$0xff]   ;;  %v36_v36 = vld [vmem:[%s1116_s0 + $0x8] sm:$0xff] }
  0x1e   :  { %849 = vmatpush3.bf16.msra.mxu1 %v941_v11  ;;  %498 = vmatprep.mubr.bf16.mxu0 %v757_v33  ;;  %v758_v37 = vcombine.low %v36_v36, %v36_v36  ;;  %v759_v38 = vcombine.high %v36_v36, %v36_v36  ;;  %v967_v39 = vld [vmem:[#allocation2 + $0x100] sm:$0xff]   ;;  %v968_v40 = vld [vmem:[#allocation2 + $0x148] sm:$0xff]   ;;  %v970_v42 = vld [vmem:[#allocation2 + $0x150] sm:$0xff]  }
  0x1f   :  { %850 = vmatprep.subr.bf16.mxu1 %v944_v14  ;;  %v969_v41 = vld [vmem:[#allocation2 + $0x108] sm:$0xff]   ;;  %v971_v44 = vld [vmem:[#allocation2 + $0x110] sm:$0xff]   ;;  %v972_v45 = vld [vmem:[#allocation2 + $0x158] sm:$0xff]  }
  0x20   :  { %829 = vmatpush3.bf16.msra.mxu0 %v943_v13  ;;  %538 = vmatprep.mubr.bf16.mxu1 %v759_v38  ;;  %v973_v46 = vld [vmem:[#allocation2 + $0x118] sm:$0xff]   ;;  %v974_v47 = vld [vmem:[#allocation2 + $0x160] sm:$0xff]   ;;  %v976_v49 = vld [vmem:[#allocation2 + $0x168] sm:$0xff]  }
  0x21   :  { %830 = vmatprep.subr.bf16.mxu0 %v946_v16  ;;  %v975_v48 = vld [vmem:[#allocation2 + $0x120] sm:$0xff]   ;;  %v37_v51 = vld [vmem:[%s1116_s0 + $0x10] sm:$0xff]  ;;  %v977_v52 = vld [vmem:[#allocation2 + $0x128] sm:$0xff]  }
  0x22   :  { %851 = vmatpush3.bf16.msra.mxu1 %v945_v15  ;;  %v982_v50 = vld [vmem:[#allocation2 + $0x180] sm:$0xff]   ;;  %v761_v53 = vcombine.high %v37_v51, %v37_v51  ;;  %v985_v54 = vld [vmem:[%s1116_s0 + $0x18] ss:$0 sps:$4 sm:$0xff]   ;;  %v978_v55 = vld [vmem:[#allocation2 + $0x170] sm:$0xff]   ;;  %v760_v59 = vcombine.low %v37_v51, %v37_v51 }
  0x23   :  { %852 = vmatprep.subr.bf16.mxu1 %v948_v18  ;;  %v979_v56 = vld [vmem:[#allocation2 + $0x130] sm:$0xff]   ;;  %v980_v57 = vld [vmem:[#allocation2 + $0x178] sm:$0xff]   ;;  %v986_v60 = vld [vmem:[%s1119_s3] sm:$0xff]  }
  0x24   :  { %831 = vmatpush3.bf16.msra.mxu0 %v947_v17  ;;  %v981_v58 = vld [vmem:[#allocation2 + $0x138] sm:$0xff]   ;;  %v987_v61 = vld [vmem:[%s1119_s3 + $0x8] sm:$0xff]   ;;  %v988_v62 = vld [vmem:[%s1119_s3 + $0x10] sm:$0xff]  }
  0x25   :  { %832 = vmatprep.subr.bf16.mxu0 %v950_v20  ;;  %v989_v63 = vld [vmem:[%s1119_s3 + $0x18] sm:$0xff]   ;;  %v990_v0 = vld [vmem:[%s1119_s3 + $0x20] sm:$0xff]   ;;  %v991_v1 = vld [vmem:[%s1119_s3 + $0x28] sm:$0xff]  }
  0x26   :  { %853 = vmatpush3.bf16.msra.mxu1 %v949_v19  ;;  %v992_v2 = vld [vmem:[%s1119_s3 + $0x30] sm:$0xff]   ;;  %v993_v3 = vld [vmem:[%s1119_s3 + $0x38] sm:$0xff]   ;;  %v755_v5 = vld [vmem:[%s1118_s2] ss:$0 sm:$0xff] }
  0x27   :  { %854 = vmatprep.subr.bf16.mxu1 %v952_v22 }
  0x28   :  { %833 = vmatpush3.bf16.msra.mxu0 %v951_v21 }
  0x29   :  { %834 = vmatprep.subr.bf16.mxu0 %v954_v24 }
  0x2a   :  { %855 = vmatpush3.bf16.msra.mxu1 %v953_v23 }
  0x2b   :  { %856 = vmatprep.subr.bf16.mxu1 %v956_v26 }
  0x2c   :  { %835 = vmatpush3.bf16.msra.mxu0 %v955_v25 }
  0x2d   :  { %836 = vmatprep.subr.bf16.mxu0 %v958_v28 }
  0x2e   :  { %857 = vmatpush3.bf16.msra.mxu1 %v957_v27 }
  0x2f   :  { %858 = vmatprep.subr.bf16.mxu1 %v960_v30  ;;  %v813_v30 = vld [vmem:[%s1120_s4] ss:$0 sm:$0xff] }
  0x30   :  { %837 = vmatpush3.bf16.msra.mxu0 %v959_v29 }
  0x31   :  { %866 = vmatprep.subr.bf16.mxu0 %v964_v35 }
  0x32   :  { %859 = vmatpush3.bf16.msra.mxu1 %v963_v34 }
  0x33   :  { %499 = vmatmul.mubr.bf16.vlgmr.msra.gmra.mrb[0].mxu0 %v756_v32  ;;  %899 = vmatprep.subr.bf16.mxu1 %v1025_v43 }
  0x34   :  { %867 = vmatpush3.bf16.msra.mxu0 %v967_v39  ;;  %578 = vmatprep.mubr.bf16.mxu0 %v761_v53 }
  0x35   :  { %539 = vmatmul.mubr.bf16.vlgmr.msra.gmra.mrb[0].mxu1 %v758_v37  ;;  %868 = vmatprep.subr.bf16.mxu0 %v968_v40 }
  0x36   :  { %901 = vmatprep.mubr.msk.bf16.mxu1 %vm1026_vm0, %v1025_v43  ;;  %900 = vmatpush3.bf16.msra.mxu1 %v982_v50 }
  0x37   :  { %905 = vmatprep.subr.bf16.mxu1 %v1025_v43 }
  0x38   :  { %869 = vmatpush3.bf16.msra.mxu0 %v969_v41 }
  0x39   :  { %870 = vmatprep.subr.bf16.mxu0 %v970_v42 }
  0x3c   :  { %871 = vmatpush3.bf16.msra.mxu0 %v971_v44 }
  0x3d   :  { %872 = vmatprep.subr.bf16.mxu0 %v972_v45  ;;  %902 = vmatmul.mubr.msk.bf16.vlgmr.msra.gmra.mrb[4].mxu1 %vm462_vm1, %v985_v54 }
  0x3e   :  { %921 = vmatprep.mubr.msk.bf16.mxu1 %vm1026_vm0, %v1025_v43  ;;  %906 = vmatpush3.bf16.msra.mxu1 %v986_v60 }
  0x3f   :  { %907 = vmatprep.subr.bf16.mxu1 %v1025_v43 }
  0x40   :  { %873 = vmatpush3.bf16.msra.mxu0 %v973_v46 }
  0x41   :  { %874 = vmatprep.subr.bf16.mxu0 %v974_v47 }
  0x42   :  { %908 = vmatpush3.bf16.msra.mxu1 %v987_v61 }
  0x43   :  { %909 = vmatprep.subr.bf16.mxu1 %v1025_v43 }
  0x44   :  { %875 = vmatpush3.bf16.msra.mxu0 %v975_v48 }
  0x45   :  { %876 = vmatprep.subr.bf16.mxu0 %v976_v49 }
  0x46   :  { %910 = vmatpush3.bf16.msra.mxu1 %v988_v62 }
  0x47   :  { %911 = vmatprep.subr.bf16.mxu1 %v1025_v43 }
  0x48   :  { %877 = vmatpush3.bf16.msra.mxu0 %v977_v52 }
  0x49   :  { %878 = vmatprep.subr.bf16.mxu0 %v978_v55 }
  0x4a   :  { %912 = vmatpush3.bf16.msra.mxu1 %v989_v63 }
  0x4b   :  { %913 = vmatprep.subr.bf16.mxu1 %v1025_v43 }
  0x4c   :  { %879 = vmatpush3.bf16.msra.mxu0 %v979_v56 }
  0x4d   :  { %880 = vmatprep.subr.bf16.mxu0 %v980_v57 }
  0x4e   :  { %914 = vmatpush3.bf16.msra.mxu1 %v990_v0 }
  0x4f   :  { %915 = vmatprep.subr.bf16.mxu1 %v1025_v43 }
  0x50   :  { %881 = vmatpush3.bf16.msra.mxu0 %v981_v58 }
  0x52   :  { %916 = vmatpush3.bf16.msra.mxu1 %v991_v1 }
  0x53   :  { %579 = vmatmul.mubr.bf16.vlgmr.msra.gmra.mrb[4].mxu0 %v760_v59  ;;  %917 = vmatprep.subr.bf16.mxu1 %v1025_v43 }
  0x56   :  { %918 = vmatpush3.bf16.msra.mxu1 %v992_v2 }
  0x57   :  { %919 = vmatprep.subr.bf16.mxu1 %v1025_v43 }
  0x5a   :  { %920 = vmatpush3.bf16.msra.mxu1 %v993_v3 }
 0x106   :  { %v838_v4 = vpop.f32.mrb[0].mxu0 }
 0x107   :  { %v839_v6 = vpop.f32.mrb[1].mxu0 }
 0x108   :  { %v840_v7 = vadd.f32 %v839_v6, %v838_v4  ;;  %v841_v8 = vpop.f32.mrb[2].mxu0  ;;  %v860_v9 = vpop.f32.mrb[0].mxu1 }
 0x109   :  { %v842_v10 = vpop.f32.mrb[3].mxu0  ;;  %v861_v11 = vpop.f32.mrb[1].mxu1 }
 0x10a   :  { %v501_v12 = vadd.f32 %v840_v7, %v755_v5  ;;  %v862_v13 = vadd.f32 %v861_v11, %v860_v9  ;;  %v863_v14 = vpop.f32.mrb[2].mxu1 }
 0x10b   :  { %v864_v15 = vpop.f32.mrb[3].mxu1 }
 0x10c   :  { %v541_v16 = vadd.f32 %v862_v13, %v501_v12 }
 0x110   :  { %v620_v17 = vpop.f32.mrb[4].mxu1 }
 0x111   :  { %v903_v18 = vpop.f32.mrb[5].mxu1 }
 0x112   :  { %v623_v19 = vpop.f32.mrb[6].mxu1 }
 0x113   :  { %v904_v20 = vpop.f32.mrb[7].mxu1 }
 0x126   :  { %v882_v21 = vpop.f32.mrb[4].mxu0 }
 0x127   :  { %v883_v22 = vpop.f32.mrb[5].mxu0 }
 0x128   :  { %v884_v23 = vadd.f32 %v883_v22, %v882_v21  ;;  %v885_v24 = vpop.f32.mrb[6].mxu0 }
 0x129   :  { %v886_v25 = vpop.f32.mrb[7].mxu0 }
 0x12a   :  { %v581_v26 = vadd.f32 %v884_v23, %v541_v16 }
 0x12c   :  { %v621_v27 = vadd.f32 %v620_v17, %v581_v26 }
 0x12e   :  { %v626_v28 = vmax.f32 %v621_v27, 0.0 }
 0x130   :  { %v627_v29 = vpack.c.bf16 %v626_v28, %v626_v28 }
 0x132   :  { %922 = vmatmul.mubr.bf16.vlgmr.msra.gmra.mrb[8].mxu1 %v627_v29 }
 0x205   :  { %v733_v31 = vpop.f32.mrb[8].mxu1 }
 0x206   :  { %v734_v32 = vadd.f32 %v813_v30, %v733_v31  ;;  %v923_v33 = vpop.f32.mrb[9].mxu1 }
 0x207   :  { %v736_v34 = vpop.f32.mrb[10].mxu1 }
 0x208   :  { %739 = vmax.xlane.f32.xlu0 %v734_v32  ;;  %v924_v35 = vpop.f32.mrb[11].mxu1 }
 0x295   :  { %v740_v36 = vpop.xlane.xlu0 %739 }
 0x296   :  { %v741_v37 = vsub.f32 %v734_v32, %v740_v36 }
 0x298   :  { %v742_v38 = vmul.f32 1.442695, %v741_v37 }
 0x29a   :  { %994 = vpow2.f32 %v742_v38 }
 0x2a4   :  { %v995_v39 = vpop.eup %994 }
 0x2a5   :  { %744 = vadd.xlane.f32.xlu0 %v995_v39 }
 0x332   :  { %v745_v40 = vpop.xlane.xlu0 %744 }
 0x333   :  { %996 = vlog2.f32 %v745_v40 }
 0x33d   :  { %v997_v41 = vpop.eup %996 }
 0x33e   :  { %v747_v42 = vmul.f32 0.6931472, %v997_v41 }
 0x340   :  { %v748_v43 = vsub.f32 %v741_v37, %v747_v42 }
 0x342   :  { %749 = vst [vmem:[%s1121_s5] sm:$0xff] %v748_v43 }
 0x343   :  { %754 = vsyncpa [#allocation3], 1 }

</bundles_post_ra>
